<compile_context>
chip_gen: v7x
topology: tpu7x:2x2x1
jax: 0.10.0
libtpu: 0.0.40
codegen_flags: <defaults>
</compile_context>

<pallas_src>
import jax
import jax.numpy as jnp
from jax import lax
from jax.experimental import pallas as pl
from jax.experimental.pallas import tpu as pltpu


# ----------------------------- tiling helpers -----------------------------

def _round_up(x, m):
    return ((x + m - 1) // m) * m


def _pick_tile(total, candidates):
    for c in candidates:
        if total % c == 0:
            return c
    return total


def _pick_th(h_pad):
    # Prefer >= 2 H tiles so the 'parallel' grid axes can shard across v7x's
    # two TensorCores; keep TH lane-dense (multiple of 128) and <= 512.
    for th in (512, 256, 128):
        if h_pad % th == 0 and h_pad // th >= 2:
            return th
    return h_pad            # h_pad == 128 -> single H tile


def _pick_tt(T, tb, th):
    # Time-chunk size: keep (pre f32 + seq_h f32 + gate bf16), double
    # buffered, under ~20 MiB so tiles also fit v7x's 64 MiB physical VMEM.
    per_step = 2 * (4 + 4 + 2) * tb * th
    cap = max(1, (20 * 1024 * 1024) // per_step)
    for c in (64, 32, 16, 8, 4, 2, 1):
        if c <= min(T, cap):
            return c
    return 1


def _activation(nonlinearity):
    if nonlinearity == "relu":
        return lambda v: jnp.maximum(v, 0.0)
    if nonlinearity == "tanh":
        return jnp.tanh
    if nonlinearity == "elu":
        return jax.nn.elu
    raise ValueError(f"Unknown nonlinearity: {nonlinearity}")


# ----------------------------- Pallas kernel ------------------------------

def _make_recurrent_kernel(nonlinearity, tt, tb, th, unroll):
    act = _activation(nonlinearity)

    def kernel(pre_ref, rows_ref, seq_h_ref, seq_g_ref, hx_sc, up_sc, cum_sc):
        tc = pl.program_id(2)

        # Initialize the carried state at the start of each (H-tile, B-tile)
        # time run; state stays in VMEM scratch across time chunks.
        @pl.when(tc == 0)
        def _init():
            hx_sc[...] = jnp.broadcast_to(rows_ref[3:4, :], (tb, th))
            up_sc[...] = jnp.full((tb, th), 1.0, jnp.float32)
            cum_sc[...] = jnp.zeros((tb, th), jnp.float32)

        # Row parameters: read once per chunk, hoisted out of the time loop.
        w_hh = rows_ref[0:1, :]
        w_uh = rows_ref[1:2, :]
        b_uh = rows_ref[2:3, :]

        def step(t, carry):
            hx, up_prev, cum_prev = carry
            # pre already contains x @ W_ih^T + b_ih (hoisted batched matmul),
            # so the recurrence is pure VPU/EUP streaming work.
            new_hx = act(pre_ref[t] + w_hh * hx)
            tilde = jax.nn.sigmoid(new_hx * w_uh + b_uh)
            cum = cum_prev + jnp.minimum(up_prev, 1.0 - cum_prev)
            gate = jnp.round(cum)                       # BinaryLayer.forward
            new_h = hx + gate * (new_hx - hx)           # lerp form: fewer ops
            new_up = up_prev + gate * (tilde - up_prev)
            new_cum = (1.0 - gate) * cum
            seq_h_ref[t] = new_h
            seq_g_ref[t] = gate.astype(jnp.bfloat16)    # exact: gate in {0,1}
            return (new_h, new_up, new_cum)

        hx, up, cum = lax.fori_loop(
            0, tt, step, (hx_sc[...], up_sc[...], cum_sc[...]), unroll=unroll)

        # Persist the carried state for the next time chunk.
        hx_sc[...] = hx
        up_sc[...] = up
        cum_sc[...] = cum

    return kernel


def _recurrent_pallas(pre, rows, *, tt, tb, th, nonlinearity):
    """Fused SkipIndRNNCell recurrence over padded (T_pad,B_pad,H_pad) pre-act."""
    t_pad, b_pad, h_pad = pre.shape
    grid = (h_pad // th, b_pad // tb, t_pad // tt)
    unroll = min(tt, 8)                  # both powers of two -> divides tt

    blk3 = lambda hh, bb, tc: (tc, bb, hh)
    pre_spec = pl.BlockSpec((tt, tb, th), blk3)
    row_spec = pl.BlockSpec((4, th), lambda hh, bb, tc: (0, hh))
    seq_spec = pl.BlockSpec((tt, tb, th), blk3)

    out_shape = (
        jax.ShapeDtypeStruct((t_pad, b_pad, h_pad), jnp.float32),   # new_h seq
        jax.ShapeDtypeStruct((t_pad, b_pad, h_pad), jnp.bfloat16),  # gate seq
    )
    return pl.pallas_call(
        _make_recurrent_kernel(nonlinearity, tt, tb, th, unroll),
        out_shape=out_shape,
        grid_spec=pltpu.PrefetchScalarGridSpec(
            num_scalar_prefetch=0,
            grid=grid,
            in_specs=[pre_spec, row_spec],
            out_specs=[seq_spec, seq_spec],
            scratch_shapes=[pltpu.VMEM((tb, th), jnp.float32)] * 3,
        ),
        compiler_params=pltpu.CompilerParams(
            dimension_semantics=("parallel", "parallel", "arbitrary"),
            vmem_limit_bytes=48 * 1024 * 1024,   # safe on v7x (64 MiB VMEM/TC)
        ),
    )(pre, rows)


# ----------------------------- forward pass -------------------------------

def skip_indrnn_forward(x, layer_params, initial_hs, *, nonlinearity="relu"):
    """SkipIndRNN.forward (batch_first=False, unidirectional, no batch_norm).

    x: (T, B, input_size). Returns (x_out, x_up, h_cat) matching
    (x.squeeze(), x_up.squeeze(), torch.cat(hiddens, -1)) of the module."""
    # TODO(synk): bidirectional / batch_norm branches (module defaults: off).
    T, B, I = x.shape
    H = layer_params[0][1].shape[0]
    f32 = jnp.float32

    h_pad = _round_up(H, 128)
    b_pad = _round_up(B, 16)                 # x16: bf16-friendly sublane blocks
    th = _pick_th(h_pad)
    tb = _pick_tile(b_pad, (128, 64, 32, 16))
    tt = _pick_tt(T, tb, th)
    t_pad = _round_up(T, tt)

    # Pad once; activations stay in the padded (T_pad, B_pad, *) layout
    # between layers (no per-layer HBM pad/slice round trips).
    i_pad = _round_up(I, 128)
    cur = jnp.zeros((t_pad, b_pad, i_pad), f32).at[:T, :B, :I].set(x.astype(f32))

    seq_list, gate_list = [], []
    for params, h_init in zip(layer_params, initial_hs):
        w_ih, w_hh, w_uh, b_ih, b_uh = params
        in_size = w_ih.shape[1]
        in_pad = cur.shape[2]

        wih_t = jnp.zeros((in_pad, h_pad), f32).at[:in_size, :H].set(
            jnp.transpose(w_ih).astype(f32))
        bih = jnp.zeros((1, 1, h_pad), f32).at[0, 0, :H].set(b_ih.astype(f32))

        # Hoisted, time-batched input projection: one (T*B, in) x (in, H)
        # matmul per layer instead of a tiny M=TB matmul per timestep.
        pre = jnp.einsum("tbi,ih->tbh", cur, wih_t,
                         precision=lax.Precision.HIGHEST,
                         preferred_element_type=f32) + bih

        # Pack all per-hidden row params + initial hidden into one (4, H_pad).
        rows = jnp.zeros((4, h_pad), f32)
        rows = rows.at[0, :H].set(w_hh.astype(f32))
        rows = rows.at[1, :H].set(w_uh.reshape(-1).astype(f32))
        rows = rows.at[2, :].set(b_uh[0].astype(f32))
        rows = rows.at[3, :H].set(h_init.astype(f32))

        seq_h, seq_g = _recurrent_pallas(pre, rows, tt=tt, tb=tb, th=th,
                                         nonlinearity=nonlinearity)
        seq_list.append(seq_h)
        gate_list.append(seq_g)
        cur = seq_h          # padded layout feeds the next layer directly

    x_out = jnp.squeeze(jnp.stack([s[:T, :B, :H] for s in seq_list], 0))
    x_up = jnp.squeeze(jnp.stack(
        [g[:T, :B, :H].astype(f32) for g in gate_list], 0))
    h_cat = jnp.concatenate([s[T - 1, :B, :H] for s in seq_list], -1)
    return x_out, x_up, h_cat


def init_params(key, input_size, hidden_size,
                hidden_min_abs=0.0, hidden_max_abs=1000.0):
    """Deterministic init mirroring SkipIndRNNCell.reset_parameters()."""
    k_ih, k_uh = jax.random.split(key)
    w_ih = 0.01 * jax.random.normal(k_ih, (hidden_size, input_size), jnp.float32)
    w_hh = jnp.ones((hidden_size,), jnp.float32)
    w_hh = jnp.clip(w_hh, -hidden_max_abs, hidden_max_abs)   # check_bounds
    std = jnp.sqrt(2.0) * jnp.sqrt(2.0 / (hidden_size + 1))  # xavier, gain=sqrt(2)
    w_uh = std * jax.random.normal(k_uh, (1, hidden_size), jnp.float32)
    b_ih = jnp.zeros((hidden_size,), jnp.float32)
    b_uh = jnp.zeros((1,), jnp.float32)
    return (w_ih, w_hh, w_uh, b_ih, b_uh)


# ----------------------------- pure-JAX reference -----------------------------

def _ref_cell_seq(x, h, params, nonlinearity="relu"):
    act = {"relu": jax.nn.relu, "tanh": jnp.tanh, "elu": jax.nn.elu}[nonlinearity]
    w_ih, w_hh, w_uh, b_ih, b_uh = params

    def step(carry, xt):
        hx, up, cum = carry
        new_hx = act(jnp.dot(xt, w_ih.T, precision=lax.Precision.HIGHEST)
                     + b_ih + w_hh * hx)
        tilde = jax.nn.sigmoid(new_hx * w_uh + b_uh)
        c = cum + jnp.minimum(up, 1.0 - cum)
        g = jnp.round(c)
        nh = g * new_hx + (1.0 - g) * hx
        nup = g * tilde + (1.0 - g) * up
        ncum = (1.0 - g) * c
        return (nh, nup, ncum), (nh, g)

    carry, (seq_h, seq_g) = lax.scan(step, h, x)
    return seq_h, seq_g, carry


def _ref_forward(x, layer_params, initial_hs, nonlinearity="relu"):
    T, B, _ = x.shape
    seq_outs, gate_outs, hiddens = [], [], []
    cur = x
    for params, h_init in zip(layer_params, initial_hs):
        H = params[1].shape[0]
        h0 = jnp.broadcast_to(h_init[None, :], (B, H))
        up0 = jnp.ones((B, H), jnp.float32)
        cum0 = jnp.zeros((B, H), jnp.float32)
        seq_h, seq_g, (hN, _, _) = _ref_cell_seq(
            cur, (h0, up0, cum0), params, nonlinearity)
        seq_outs.append(seq_h)
        gate_outs.append(seq_g)
        hiddens.append(hN)
        cur = seq_h
    return (jnp.squeeze(jnp.stack(seq_outs, 0)),
            jnp.squeeze(jnp.stack(gate_outs, 0)),
            jnp.concatenate(hiddens, -1))


if __name__ == "__main__":
    T, B, I, H, L = 8, 2, 16, 32, 2
    key = jax.random.PRNGKey(0)
    kx, kh, kp = jax.random.split(key, 3)

    x = jax.random.normal(kx, (T, B, I), jnp.float32)

    layer_keys = jax.random.split(kp, L)
    hinit_keys = jax.random.split(kh, L)
    layer_params, initial_hs = [], []
    for l in range(L):
        in_size = I if l == 0 else H
        layer_params.append(init_params(layer_keys[l], in_size, H))
        initial_hs.append(jax.random.normal(hinit_keys[l], (H,), jnp.float32))

    out = jax.block_until_ready(
        skip_indrnn_forward(x, layer_params, initial_hs))
    ref = _ref_forward(x, layer_params, initial_hs)

    for name, a, b in zip(("x_out", "x_up", "hiddens"), out, ref):
        assert a.shape == b.shape, (name, a.shape, b.shape)
        assert jnp.allclose(a, b, atol=2e-4, rtol=2e-4), (
            name, float(jnp.max(jnp.abs(a - b))))

    print("KERNEL_OK")
</pallas_src>

<mosaic_0001>
module attributes {stable_mosaic.version = 11 : i64} {
  func.func @kernel(%arg0: i32, %arg1: i32, %arg2: i32, %arg3: memref<8x16x128xf32, #tpu.memory_space<vmem>>, %arg4: memref<4x128xf32, #tpu.memory_space<vmem>>, %arg5: memref<8x16x128xf32, #tpu.memory_space<vmem>>, %arg6: memref<8x16x128xbf16, #tpu.memory_space<vmem>>, %arg7: memref<16x128xf32, #tpu.memory_space<vmem>>, %arg8: memref<16x128xf32, #tpu.memory_space<vmem>>, %arg9: memref<16x128xf32, #tpu.memory_space<vmem>>) attributes {dimension_semantics = [#tpu.dimension_semantics<parallel>, #tpu.dimension_semantics<parallel>, #tpu.dimension_semantics<arbitrary>], iteration_bounds = array<i64: 1, 1, 1>, scalar_prefetch = 0 : i64, scratch_operands = 3 : i64, tpu.core_type = #tpu.core_type<tc>, window_params = [{transform_indices = @transform_0, window_bounds = array<i64: 8, 16, 128>}, {transform_indices = @transform_1, window_bounds = array<i64: 4, 128>}, {transform_indices = @transform_2, window_bounds = array<i64: 8, 16, 128>}, {transform_indices = @transform_3, window_bounds = array<i64: 8, 16, 128>}]} {
    %c0_i32 = arith.constant 0 : i32
    %0 = arith.cmpi eq, %arg2, %c0_i32 : i32
    %1 = arith.extui %0 : i1 to i32
    %c0_i32_0 = arith.constant 0 : i32
    %2 = arith.cmpi ne, %1, %c0_i32_0 : i32
    scf.if %2 {
      %c3 = arith.constant 3 : index
      %c0_96 = arith.constant 0 : index
      %332 = vector.load %arg4[%c3, %c0_96] : memref<4x128xf32, #tpu.memory_space<vmem>>, vector<1x128xf32>
      %333 = vector.shape_cast %332 : vector<1x128xf32> to vector<1x128xf32>
      %334 = vector.broadcast %333 : vector<1x128xf32> to vector<16x128xf32>
      %c0_97 = arith.constant 0 : index
      %c0_98 = arith.constant 0 : index
      %335 = vector.load %arg7[%c0_97, %c0_98] : memref<16x128xf32, #tpu.memory_space<vmem>>, vector<16x128xf32>
      tpu.vector_store %arg7[%c0_97, %c0_98], %334 {strides = array<i32>} : memref<16x128xf32, #tpu.memory_space<vmem>>, vector<16x128xf32>,
      %cst_99 = arith.constant 1.000000e+00 : f32
      %336 = vector.broadcast %cst_99 : f32 to vector<16x128xf32>
      %c0_100 = arith.constant 0 : index
      %c0_101 = arith.constant 0 : index
      %337 = vector.load %arg8[%c0_100, %c0_101] : memref<16x128xf32, #tpu.memory_space<vmem>>, vector<16x128xf32>
      tpu.vector_store %arg8[%c0_100, %c0_101], %336 {strides = array<i32>} : memref<16x128xf32, #tpu.memory_space<vmem>>, vector<16x128xf32>,
      %cst_102 = arith.constant 0.000000e+00 : f32
      %338 = vector.broadcast %cst_102 : f32 to vector<16x128xf32>
      %c0_103 = arith.constant 0 : index
      %c0_104 = arith.constant 0 : index
      %339 = vector.load %arg9[%c0_103, %c0_104] : memref<16x128xf32, #tpu.memory_space<vmem>>, vector<16x128xf32>
      tpu.vector_store %arg9[%c0_103, %c0_104], %338 {strides = array<i32>} : memref<16x128xf32, #tpu.memory_space<vmem>>, vector<16x128xf32>,
    } else {
    }
    %c0 = arith.constant 0 : index
    %c0_1 = arith.constant 0 : index
    %3 = vector.load %arg4[%c0, %c0_1] : memref<4x128xf32, #tpu.memory_space<vmem>>, vector<1x128xf32>
    %c1 = arith.constant 1 : index
    %c0_2 = arith.constant 0 : index
    %4 = vector.load %arg4[%c1, %c0_2] : memref<4x128xf32, #tpu.memory_space<vmem>>, vector<1x128xf32>
    %c2 = arith.constant 2 : index
    %c0_3 = arith.constant 0 : index
    %5 = vector.load %arg4[%c2, %c0_3] : memref<4x128xf32, #tpu.memory_space<vmem>>, vector<1x128xf32>
    %c0_4 = arith.constant 0 : index
    %c0_5 = arith.constant 0 : index
    %6 = vector.load %arg7[%c0_4, %c0_5] : memref<16x128xf32, #tpu.memory_space<vmem>>, vector<16x128xf32>
    %c0_6 = arith.constant 0 : index
    %c0_7 = arith.constant 0 : index
    %7 = vector.load %arg8[%c0_6, %c0_7] : memref<16x128xf32, #tpu.memory_space<vmem>>, vector<16x128xf32>
    %c0_8 = arith.constant 0 : index
    %c0_9 = arith.constant 0 : index
    %8 = vector.load %arg9[%c0_8, %c0_9] : memref<16x128xf32, #tpu.memory_space<vmem>>, vector<16x128xf32>
    %c0_i32_10 = arith.constant 0 : i32
    %9 = arith.index_cast %c0_i32_10 : i32 to index
    %c0_11 = arith.constant 0 : index
    %c0_12 = arith.constant 0 : index
    %10 = vector.load %arg3[%9, %c0_11, %c0_12] : memref<8x16x128xf32, #tpu.memory_space<vmem>>, vector<1x16x128xf32>
    %11 = vector.shape_cast %10 : vector<1x16x128xf32> to vector<16x128xf32>
    %12 = vector.broadcast %3 : vector<1x128xf32> to vector<16x128xf32>
    %13 = arith.mulf %12, %6 : vector<16x128xf32>
    %14 = arith.addf %11, %13 : vector<16x128xf32>
    %cst = arith.constant 0.000000e+00 : f32
    %15 = vector.broadcast %cst : f32 to vector<16x128xf32>
    %16 = arith.maximumf %14, %15 : vector<16x128xf32>
    %17 = vector.broadcast %4 : vector<1x128xf32> to vector<16x128xf32>
    %18 = arith.mulf %16, %17 : vector<16x128xf32>
    %19 = vector.broadcast %5 : vector<1x128xf32> to vector<16x128xf32>
    %20 = arith.addf %18, %19 : vector<16x128xf32>
    %21 = arith.negf %20 : vector<16x128xf32>
    %22 = math.exp %21 : vector<16x128xf32>
    %cst_13 = arith.constant 1.000000e+00 : f32
    %23 = vector.broadcast %cst_13 : f32 to vector<16x128xf32>
    %24 = arith.addf %23, %22 : vector<16x128xf32>
    %25 = arith.divf %23, %24 : vector<16x128xf32>
    %cst_14 = arith.constant 1.000000e+00 : f32
    %26 = vector.broadcast %cst_14 : f32 to vector<16x128xf32>
    %27 = arith.subf %26, %8 : vector<16x128xf32>
    %28 = arith.minimumf %7, %27 : vector<16x128xf32>
    %29 = arith.addf %8, %28 : vector<16x128xf32>
    %30 = math.roundeven %29 : vector<16x128xf32>
    %31 = arith.subf %16, %6 : vector<16x128xf32>
    %32 = arith.mulf %30, %31 : vector<16x128xf32>
    %33 = arith.addf %6, %32 : vector<16x128xf32>
    %34 = arith.subf %25, %7 : vector<16x128xf32>
    %35 = arith.mulf %30, %34 : vector<16x128xf32>
    %36 = arith.addf %7, %35 : vector<16x128xf32>
    %cst_15 = arith.constant 1.000000e+00 : f32
    %37 = vector.broadcast %cst_15 : f32 to vector<16x128xf32>
    %38 = arith.subf %37, %30 : vector<16x128xf32>
    %39 = arith.mulf %38, %29 : vector<16x128xf32>
    %40 = arith.index_cast %c0_i32_10 : i32 to index
    %c0_16 = arith.constant 0 : index
    %c0_17 = arith.constant 0 : index
    %41 = vector.load %arg5[%40, %c0_16, %c0_17] : memref<8x16x128xf32, #tpu.memory_space<vmem>>, vector<1x16x128xf32>
    %42 = vector.shape_cast %41 : vector<1x16x128xf32> to vector<16x128xf32>
    %43 = vector.shape_cast %33 : vector<16x128xf32> to vector<1x16x128xf32>
    tpu.vector_store %arg5[%40, %c0_16, %c0_17], %43 {strides = array<i32>} : memref<8x16x128xf32, #tpu.memory_space<vmem>>, vector<1x16x128xf32>,
    %44 = arith.truncf %30 : vector<16x128xf32> to vector<16x128xbf16>
    %45 = arith.index_cast %c0_i32_10 : i32 to index
    %c0_18 = arith.constant 0 : index
    %c0_19 = arith.constant 0 : index
    %46 = vector.load %arg6[%45, %c0_18, %c0_19] : memref<8x16x128xbf16, #tpu.memory_space<vmem>>, vector<1x16x128xbf16>
    %47 = vector.shape_cast %46 : vector<1x16x128xbf16> to vector<16x128xbf16>
    %48 = vector.shape_cast %44 : vector<16x128xbf16> to vector<1x16x128xbf16>
    tpu.vector_store %arg6[%45, %c0_18, %c0_19], %48 {strides = array<i32>} : memref<8x16x128xbf16, #tpu.memory_space<vmem>>, vector<1x16x128xbf16>,
    %c1_i32 = arith.constant 1 : i32
    %49 = arith.index_cast %c1_i32 : i32 to index
    %c0_20 = arith.constant 0 : index
    %c0_21 = arith.constant 0 : index
    %50 = vector.load %arg3[%49, %c0_20, %c0_21] : memref<8x16x128xf32, #tpu.memory_space<vmem>>, vector<1x16x128xf32>
    %51 = vector.shape_cast %50 : vector<1x16x128xf32> to vector<16x128xf32>
    %52 = vector.broadcast %3 : vector<1x128xf32> to vector<16x128xf32>
    %53 = arith.mulf %52, %33 : vector<16x128xf32>
    %54 = arith.addf %51, %53 : vector<16x128xf32>
    %cst_22 = arith.constant 0.000000e+00 : f32
    %55 = vector.broadcast %cst_22 : f32 to vector<16x128xf32>
    %56 = arith.maximumf %54, %55 : vector<16x128xf32>
    %57 = vector.broadcast %4 : vector<1x128xf32> to vector<16x128xf32>
    %58 = arith.mulf %56, %57 : vector<16x128xf32>
    %59 = vector.broadcast %5 : vector<1x128xf32> to vector<16x128xf32>
    %60 = arith.addf %58, %59 : vector<16x128xf32>
    %61 = arith.negf %60 : vector<16x128xf32>
    %62 = math.exp %61 : vector<16x128xf32>
    %cst_23 = arith.constant 1.000000e+00 : f32
    %63 = vector.broadcast %cst_23 : f32 to vector<16x128xf32>
    %64 = arith.addf %63, %62 : vector<16x128xf32>
    %65 = arith.divf %63, %64 : vector<16x128xf32>
    %cst_24 = arith.constant 1.000000e+00 : f32
    %66 = vector.broadcast %cst_24 : f32 to vector<16x128xf32>
    %67 = arith.subf %66, %39 : vector<16x128xf32>
    %68 = arith.minimumf %36, %67 : vector<16x128xf32>
    %69 = arith.addf %39, %68 : vector<16x128xf32>
    %70 = math.roundeven %69 : vector<16x128xf32>
    %71 = arith.subf %56, %33 : vector<16x128xf32>
    %72 = arith.mulf %70, %71 : vector<16x128xf32>
    %73 = arith.addf %33, %72 : vector<16x128xf32>
    %74 = arith.subf %65, %36 : vector<16x128xf32>
    %75 = arith.mulf %70, %74 : vector<16x128xf32>
    %76 = arith.addf %36, %75 : vector<16x128xf32>
    %cst_25 = arith.constant 1.000000e+00 : f32
    %77 = vector.broadcast %cst_25 : f32 to vector<16x128xf32>
    %78 = arith.subf %77, %70 : vector<16x128xf32>
    %79 = arith.mulf %78, %69 : vector<16x128xf32>
    %80 = arith.index_cast %c1_i32 : i32 to index
    %c0_26 = arith.constant 0 : index
    %c0_27 = arith.constant 0 : index
    %81 = vector.load %arg5[%80, %c0_26, %c0_27] : memref<8x16x128xf32, #tpu.memory_space<vmem>>, vector<1x16x128xf32>
    %82 = vector.shape_cast %81 : vector<1x16x128xf32> to vector<16x128xf32>
    %83 = vector.shape_cast %73 : vector<16x128xf32> to vector<1x16x128xf32>
    tpu.vector_store %arg5[%80, %c0_26, %c0_27], %83 {strides = array<i32>} : memref<8x16x128xf32, #tpu.memory_space<vmem>>, vector<1x16x128xf32>,
    %84 = arith.truncf %70 : vector<16x128xf32> to vector<16x128xbf16>
    %85 = arith.index_cast %c1_i32 : i32 to index
    %c0_28 = arith.constant 0 : index
    %c0_29 = arith.constant 0 : index
    %86 = vector.load %arg6[%85, %c0_28, %c0_29] : memref<8x16x128xbf16, #tpu.memory_space<vmem>>, vector<1x16x128xbf16>
    %87 = vector.shape_cast %86 : vector<1x16x128xbf16> to vector<16x128xbf16>
    %88 = vector.shape_cast %84 : vector<16x128xbf16> to vector<1x16x128xbf16>
    tpu.vector_store %arg6[%85, %c0_28, %c0_29], %88 {strides = array<i32>} : memref<8x16x128xbf16, #tpu.memory_space<vmem>>, vector<1x16x128xbf16>,
    %c2_i32 = arith.constant 2 : i32
    %89 = arith.index_cast %c2_i32 : i32 to index
    %c0_30 = arith.constant 0 : index
    %c0_31 = arith.constant 0 : index
    %90 = vector.load %arg3[%89, %c0_30, %c0_31] : memref<8x16x128xf32, #tpu.memory_space<vmem>>, vector<1x16x128xf32>
    %91 = vector.shape_cast %90 : vector<1x16x128xf32> to vector<16x128xf32>
    %92 = vector.broadcast %3 : vector<1x128xf32> to vector<16x128xf32>
    %93 = arith.mulf %92, %73 : vector<16x128xf32>
    %94 = arith.addf %91, %93 : vector<16x128xf32>
    %cst_32 = arith.constant 0.000000e+00 : f32
    %95 = vector.broadcast %cst_32 : f32 to vector<16x128xf32>
    %96 = arith.maximumf %94, %95 : vector<16x128xf32>
    %97 = vector.broadcast %4 : vector<1x128xf32> to vector<16x128xf32>
    %98 = arith.mulf %96, %97 : vector<16x128xf32>
    %99 = vector.broadcast %5 : vector<1x128xf32> to vector<16x128xf32>
    %100 = arith.addf %98, %99 : vector<16x128xf32>
    %101 = arith.negf %100 : vector<16x128xf32>
    %102 = math.exp %101 : vector<16x128xf32>
    %cst_33 = arith.constant 1.000000e+00 : f32
    %103 = vector.broadcast %cst_33 : f32 to vector<16x128xf32>
    %104 = arith.addf %103, %102 : vector<16x128xf32>
    %105 = arith.divf %103, %104 : vector<16x128xf32>
    %cst_34 = arith.constant 1.000000e+00 : f32
    %106 = vector.broadcast %cst_34 : f32 to vector<16x128xf32>
    %107 = arith.subf %106, %79 : vector<16x128xf32>
    %108 = arith.minimumf %76, %107 : vector<16x128xf32>
    %109 = arith.addf %79, %108 : vector<16x128xf32>
    %110 = math.roundeven %109 : vector<16x128xf32>
    %111 = arith.subf %96, %73 : vector<16x128xf32>
    %112 = arith.mulf %110, %111 : vector<16x128xf32>
    %113 = arith.addf %73, %112 : vector<16x128xf32>
    %114 = arith.subf %105, %76 : vector<16x128xf32>
    %115 = arith.mulf %110, %114 : vector<16x128xf32>
    %116 = arith.addf %76, %115 : vector<16x128xf32>
    %cst_35 = arith.constant 1.000000e+00 : f32
    %117 = vector.broadcast %cst_35 : f32 to vector<16x128xf32>
    %118 = arith.subf %117, %110 : vector<16x128xf32>
    %119 = arith.mulf %118, %109 : vector<16x128xf32>
    %120 = arith.index_cast %c2_i32 : i32 to index
    %c0_36 = arith.constant 0 : index
    %c0_37 = arith.constant 0 : index
    %121 = vector.load %arg5[%120, %c0_36, %c0_37] : memref<8x16x128xf32, #tpu.memory_space<vmem>>, vector<1x16x128xf32>
    %122 = vector.shape_cast %121 : vector<1x16x128xf32> to vector<16x128xf32>
    %123 = vector.shape_cast %113 : vector<16x128xf32> to vector<1x16x128xf32>
    tpu.vector_store %arg5[%120, %c0_36, %c0_37], %123 {strides = array<i32>} : memref<8x16x128xf32, #tpu.memory_space<vmem>>, vector<1x16x128xf32>,
    %124 = arith.truncf %110 : vector<16x128xf32> to vector<16x128xbf16>
    %125 = arith.index_cast %c2_i32 : i32 to index
    %c0_38 = arith.constant 0 : index
    %c0_39 = arith.constant 0 : index
    %126 = vector.load %arg6[%125, %c0_38, %c0_39] : memref<8x16x128xbf16, #tpu.memory_space<vmem>>, vector<1x16x128xbf16>
    %127 = vector.shape_cast %126 : vector<1x16x128xbf16> to vector<16x128xbf16>
    %128 = vector.shape_cast %124 : vector<16x128xbf16> to vector<1x16x128xbf16>
    tpu.vector_store %arg6[%125, %c0_38, %c0_39], %128 {strides = array<i32>} : memref<8x16x128xbf16, #tpu.memory_space<vmem>>, vector<1x16x128xbf16>,
    %c3_i32 = arith.constant 3 : i32
    %129 = arith.index_cast %c3_i32 : i32 to index
    %c0_40 = arith.constant 0 : index
    %c0_41 = arith.constant 0 : index
    %130 = vector.load %arg3[%129, %c0_40, %c0_41] : memref<8x16x128xf32, #tpu.memory_space<vmem>>, vector<1x16x128xf32>
    %131 = vector.shape_cast %130 : vector<1x16x128xf32> to vector<16x128xf32>
    %132 = vector.broadcast %3 : vector<1x128xf32> to vector<16x128xf32>
    %133 = arith.mulf %132, %113 : vector<16x128xf32>
    %134 = arith.addf %131, %133 : vector<16x128xf32>
    %cst_42 = arith.constant 0.000000e+00 : f32
    %135 = vector.broadcast %cst_42 : f32 to vector<16x128xf32>
    %136 = arith.maximumf %134, %135 : vector<16x128xf32>
    %137 = vector.broadcast %4 : vector<1x128xf32> to vector<16x128xf32>
    %138 = arith.mulf %136, %137 : vector<16x128xf32>
    %139 = vector.broadcast %5 : vector<1x128xf32> to vector<16x128xf32>
    %140 = arith.addf %138, %139 : vector<16x128xf32>
    %141 = arith.negf %140 : vector<16x128xf32>
    %142 = math.exp %141 : vector<16x128xf32>
    %cst_43 = arith.constant 1.000000e+00 : f32
    %143 = vector.broadcast %cst_43 : f32 to vector<16x128xf32>
    %144 = arith.addf %143, %142 : vector<16x128xf32>
    %145 = arith.divf %143, %144 : vector<16x128xf32>
    %cst_44 = arith.constant 1.000000e+00 : f32
    %146 = vector.broadcast %cst_44 : f32 to vector<16x128xf32>
    %147 = arith.subf %146, %119 : vector<16x128xf32>
    %148 = arith.minimumf %116, %147 : vector<16x128xf32>
    %149 = arith.addf %119, %148 : vector<16x128xf32>
    %150 = math.roundeven %149 : vector<16x128xf32>
    %151 = arith.subf %136, %113 : vector<16x128xf32>
    %152 = arith.mulf %150, %151 : vector<16x128xf32>
    %153 = arith.addf %113, %152 : vector<16x128xf32>
    %154 = arith.subf %145, %116 : vector<16x128xf32>
    %155 = arith.mulf %150, %154 : vector<16x128xf32>
    %156 = arith.addf %116, %155 : vector<16x128xf32>
    %cst_45 = arith.constant 1.000000e+00 : f32
    %157 = vector.broadcast %cst_45 : f32 to vector<16x128xf32>
    %158 = arith.subf %157, %150 : vector<16x128xf32>
    %159 = arith.mulf %158, %149 : vector<16x128xf32>
    %160 = arith.index_cast %c3_i32 : i32 to index
    %c0_46 = arith.constant 0 : index
    %c0_47 = arith.constant 0 : index
    %161 = vector.load %arg5[%160, %c0_46, %c0_47] : memref<8x16x128xf32, #tpu.memory_space<vmem>>, vector<1x16x128xf32>
    %162 = vector.shape_cast %161 : vector<1x16x128xf32> to vector<16x128xf32>
    %163 = vector.shape_cast %153 : vector<16x128xf32> to vector<1x16x128xf32>
    tpu.vector_store %arg5[%160, %c0_46, %c0_47], %163 {strides = array<i32>} : memref<8x16x128xf32, #tpu.memory_space<vmem>>, vector<1x16x128xf32>,
    %164 = arith.truncf %150 : vector<16x128xf32> to vector<16x128xbf16>
    %165 = arith.index_cast %c3_i32 : i32 to index
    %c0_48 = arith.constant 0 : index
    %c0_49 = arith.constant 0 : index
    %166 = vector.load %arg6[%165, %c0_48, %c0_49] : memref<8x16x128xbf16, #tpu.memory_space<vmem>>, vector<1x16x128xbf16>
    %167 = vector.shape_cast %166 : vector<1x16x128xbf16> to vector<16x128xbf16>
    %168 = vector.shape_cast %164 : vector<16x128xbf16> to vector<1x16x128xbf16>
    tpu.vector_store %arg6[%165, %c0_48, %c0_49], %168 {strides = array<i32>} : memref<8x16x128xbf16, #tpu.memory_space<vmem>>, vector<1x16x128xbf16>,
    %c4_i32 = arith.constant 4 : i32
    %169 = arith.index_cast %c4_i32 : i32 to index
    %c0_50 = arith.constant 0 : index
    %c0_51 = arith.constant 0 : index
    %170 = vector.load %arg3[%169, %c0_50, %c0_51] : memref<8x16x128xf32, #tpu.memory_space<vmem>>, vector<1x16x128xf32>
    %171 = vector.shape_cast %170 : vector<1x16x128xf32> to vector<16x128xf32>
    %172 = vector.broadcast %3 : vector<1x128xf32> to vector<16x128xf32>
    %173 = arith.mulf %172, %153 : vector<16x128xf32>
    %174 = arith.addf %171, %173 : vector<16x128xf32>
    %cst_52 = arith.constant 0.000000e+00 : f32
    %175 = vector.broadcast %cst_52 : f32 to vector<16x128xf32>
    %176 = arith.maximumf %174, %175 : vector<16x128xf32>
    %177 = vector.broadcast %4 : vector<1x128xf32> to vector<16x128xf32>
    %178 = arith.mulf %176, %177 : vector<16x128xf32>
    %179 = vector.broadcast %5 : vector<1x128xf32> to vector<16x128xf32>
    %180 = arith.addf %178, %179 : vector<16x128xf32>
    %181 = arith.negf %180 : vector<16x128xf32>
    %182 = math.exp %181 : vector<16x128xf32>
    %cst_53 = arith.constant 1.000000e+00 : f32
    %183 = vector.broadcast %cst_53 : f32 to vector<16x128xf32>
    %184 = arith.addf %183, %182 : vector<16x128xf32>
    %185 = arith.divf %183, %184 : vector<16x128xf32>
    %cst_54 = arith.constant 1.000000e+00 : f32
    %186 = vector.broadcast %cst_54 : f32 to vector<16x128xf32>
    %187 = arith.subf %186, %159 : vector<16x128xf32>
    %188 = arith.minimumf %156, %187 : vector<16x128xf32>
    %189 = arith.addf %159, %188 : vector<16x128xf32>
    %190 = math.roundeven %189 : vector<16x128xf32>
    %191 = arith.subf %176, %153 : vector<16x128xf32>
    %192 = arith.mulf %190, %191 : vector<16x128xf32>
    %193 = arith.addf %153, %192 : vector<16x128xf32>
    %194 = arith.subf %185, %156 : vector<16x128xf32>
    %195 = arith.mulf %190, %194 : vector<16x128xf32>
    %196 = arith.addf %156, %195 : vector<16x128xf32>
    %cst_55 = arith.constant 1.000000e+00 : f32
    %197 = vector.broadcast %cst_55 : f32 to vector<16x128xf32>
    %198 = arith.subf %197, %190 : vector<16x128xf32>
    %199 = arith.mulf %198, %189 : vector<16x128xf32>
    %200 = arith.index_cast %c4_i32 : i32 to index
    %c0_56 = arith.constant 0 : index
    %c0_57 = arith.constant 0 : index
    %201 = vector.load %arg5[%200, %c0_56, %c0_57] : memref<8x16x128xf32, #tpu.memory_space<vmem>>, vector<1x16x128xf32>
    %202 = vector.shape_cast %201 : vector<1x16x128xf32> to vector<16x128xf32>
    %203 = vector.shape_cast %193 : vector<16x128xf32> to vector<1x16x128xf32>
    tpu.vector_store %arg5[%200, %c0_56, %c0_57], %203 {strides = array<i32>} : memref<8x16x128xf32, #tpu.memory_space<vmem>>, vector<1x16x128xf32>,
    %204 = arith.truncf %190 : vector<16x128xf32> to vector<16x128xbf16>
    %205 = arith.index_cast %c4_i32 : i32 to index
    %c0_58 = arith.constant 0 : index
    %c0_59 = arith.constant 0 : index
    %206 = vector.load %arg6[%205, %c0_58, %c0_59] : memref<8x16x128xbf16, #tpu.memory_space<vmem>>, vector<1x16x128xbf16>
    %207 = vector.shape_cast %206 : vector<1x16x128xbf16> to vector<16x128xbf16>
    %208 = vector.shape_cast %204 : vector<16x128xbf16> to vector<1x16x128xbf16>
    tpu.vector_store %arg6[%205, %c0_58, %c0_59], %208 {strides = array<i32>} : memref<8x16x128xbf16, #tpu.memory_space<vmem>>, vector<1x16x128xbf16>,
    %c5_i32 = arith.constant 5 : i32
    %209 = arith.index_cast %c5_i32 : i32 to index
    %c0_60 = arith.constant 0 : index
    %c0_61 = arith.constant 0 : index
    %210 = vector.load %arg3[%209, %c0_60, %c0_61] : memref<8x16x128xf32, #tpu.memory_space<vmem>>, vector<1x16x128xf32>
    %211 = vector.shape_cast %210 : vector<1x16x128xf32> to vector<16x128xf32>
    %212 = vector.broadcast %3 : vector<1x128xf32> to vector<16x128xf32>
    %213 = arith.mulf %212, %193 : vector<16x128xf32>
    %214 = arith.addf %211, %213 : vector<16x128xf32>
    %cst_62 = arith.constant 0.000000e+00 : f32
    %215 = vector.broadcast %cst_62 : f32 to vector<16x128xf32>
    %216 = arith.maximumf %214, %215 : vector<16x128xf32>
    %217 = vector.broadcast %4 : vector<1x128xf32> to vector<16x128xf32>
    %218 = arith.mulf %216, %217 : vector<16x128xf32>
    %219 = vector.broadcast %5 : vector<1x128xf32> to vector<16x128xf32>
    %220 = arith.addf %218, %219 : vector<16x128xf32>
    %221 = arith.negf %220 : vector<16x128xf32>
    %222 = math.exp %221 : vector<16x128xf32>
    %cst_63 = arith.constant 1.000000e+00 : f32
    %223 = vector.broadcast %cst_63 : f32 to vector<16x128xf32>
    %224 = arith.addf %223, %222 : vector<16x128xf32>
    %225 = arith.divf %223, %224 : vector<16x128xf32>
    %cst_64 = arith.constant 1.000000e+00 : f32
    %226 = vector.broadcast %cst_64 : f32 to vector<16x128xf32>
    %227 = arith.subf %226, %199 : vector<16x128xf32>
    %228 = arith.minimumf %196, %227 : vector<16x128xf32>
    %229 = arith.addf %199, %228 : vector<16x128xf32>
    %230 = math.roundeven %229 : vector<16x128xf32>
    %231 = arith.subf %216, %193 : vector<16x128xf32>
    %232 = arith.mulf %230, %231 : vector<16x128xf32>
    %233 = arith.addf %193, %232 : vector<16x128xf32>
    %234 = arith.subf %225, %196 : vector<16x128xf32>
    %235 = arith.mulf %230, %234 : vector<16x128xf32>
    %236 = arith.addf %196, %235 : vector<16x128xf32>
    %cst_65 = arith.constant 1.000000e+00 : f32
    %237 = vector.broadcast %cst_65 : f32 to vector<16x128xf32>
    %238 = arith.subf %237, %230 : vector<16x128xf32>
    %239 = arith.mulf %238, %229 : vector<16x128xf32>
    %240 = arith.index_cast %c5_i32 : i32 to index
    %c0_66 = arith.constant 0 : index
    %c0_67 = arith.constant 0 : index
    %241 = vector.load %arg5[%240, %c0_66, %c0_67] : memref<8x16x128xf32, #tpu.memory_space<vmem>>, vector<1x16x128xf32>
    %242 = vector.shape_cast %241 : vector<1x16x128xf32> to vector<16x128xf32>
    %243 = vector.shape_cast %233 : vector<16x128xf32> to vector<1x16x128xf32>
    tpu.vector_store %arg5[%240, %c0_66, %c0_67], %243 {strides = array<i32>} : memref<8x16x128xf32, #tpu.memory_space<vmem>>, vector<1x16x128xf32>,
    %244 = arith.truncf %230 : vector<16x128xf32> to vector<16x128xbf16>
    %245 = arith.index_cast %c5_i32 : i32 to index
    %c0_68 = arith.constant 0 : index
    %c0_69 = arith.constant 0 : index
    %246 = vector.load %arg6[%245, %c0_68, %c0_69] : memref<8x16x128xbf16, #tpu.memory_space<vmem>>, vector<1x16x128xbf16>
    %247 = vector.shape_cast %246 : vector<1x16x128xbf16> to vector<16x128xbf16>
    %248 = vector.shape_cast %244 : vector<16x128xbf16> to vector<1x16x128xbf16>
    tpu.vector_store %arg6[%245, %c0_68, %c0_69], %248 {strides = array<i32>} : memref<8x16x128xbf16, #tpu.memory_space<vmem>>, vector<1x16x128xbf16>,
    %c6_i32 = arith.constant 6 : i32
    %249 = arith.index_cast %c6_i32 : i32 to index
    %c0_70 = arith.constant 0 : index
    %c0_71 = arith.constant 0 : index
    %250 = vector.load %arg3[%249, %c0_70, %c0_71] : memref<8x16x128xf32, #tpu.memory_space<vmem>>, vector<1x16x128xf32>
    %251 = vector.shape_cast %250 : vector<1x16x128xf32> to vector<16x128xf32>
    %252 = vector.broadcast %3 : vector<1x128xf32> to vector<16x128xf32>
    %253 = arith.mulf %252, %233 : vector<16x128xf32>
    %254 = arith.addf %251, %253 : vector<16x128xf32>
    %cst_72 = arith.constant 0.000000e+00 : f32
    %255 = vector.broadcast %cst_72 : f32 to vector<16x128xf32>
    %256 = arith.maximumf %254, %255 : vector<16x128xf32>
    %257 = vector.broadcast %4 : vector<1x128xf32> to vector<16x128xf32>
    %258 = arith.mulf %256, %257 : vector<16x128xf32>
    %259 = vector.broadcast %5 : vector<1x128xf32> to vector<16x128xf32>
    %260 = arith.addf %258, %259 : vector<16x128xf32>
    %261 = arith.negf %260 : vector<16x128xf32>
    %262 = math.exp %261 : vector<16x128xf32>
    %cst_73 = arith.constant 1.000000e+00 : f32
    %263 = vector.broadcast %cst_73 : f32 to vector<16x128xf32>
    %264 = arith.addf %263, %262 : vector<16x128xf32>
    %265 = arith.divf %263, %264 : vector<16x128xf32>
    %cst_74 = arith.constant 1.000000e+00 : f32
    %266 = vector.broadcast %cst_74 : f32 to vector<16x128xf32>
    %267 = arith.subf %266, %239 : vector<16x128xf32>
    %268 = arith.minimumf %236, %267 : vector<16x128xf32>
    %269 = arith.addf %239, %268 : vector<16x128xf32>
    %270 = math.roundeven %269 : vector<16x128xf32>
    %271 = arith.subf %256, %233 : vector<16x128xf32>
    %272 = arith.mulf %270, %271 : vector<16x128xf32>
    %273 = arith.addf %233, %272 : vector<16x128xf32>
    %274 = arith.subf %265, %236 : vector<16x128xf32>
    %275 = arith.mulf %270, %274 : vector<16x128xf32>
    %276 = arith.addf %236, %275 : vector<16x128xf32>
    %cst_75 = arith.constant 1.000000e+00 : f32
    %277 = vector.broadcast %cst_75 : f32 to vector<16x128xf32>
    %278 = arith.subf %277, %270 : vector<16x128xf32>
    %279 = arith.mulf %278, %269 : vector<16x128xf32>
    %280 = arith.index_cast %c6_i32 : i32 to index
    %c0_76 = arith.constant 0 : index
    %c0_77 = arith.constant 0 : index
    %281 = vector.load %arg5[%280, %c0_76, %c0_77] : memref<8x16x128xf32, #tpu.memory_space<vmem>>, vector<1x16x128xf32>
    %282 = vector.shape_cast %281 : vector<1x16x128xf32> to vector<16x128xf32>
    %283 = vector.shape_cast %273 : vector<16x128xf32> to vector<1x16x128xf32>
    tpu.vector_store %arg5[%280, %c0_76, %c0_77], %283 {strides = array<i32>} : memref<8x16x128xf32, #tpu.memory_space<vmem>>, vector<1x16x128xf32>,
    %284 = arith.truncf %270 : vector<16x128xf32> to vector<16x128xbf16>
    %285 = arith.index_cast %c6_i32 : i32 to index
    %c0_78 = arith.constant 0 : index
    %c0_79 = arith.constant 0 : index
    %286 = vector.load %arg6[%285, %c0_78, %c0_79] : memref<8x16x128xbf16, #tpu.memory_space<vmem>>, vector<1x16x128xbf16>
    %287 = vector.shape_cast %286 : vector<1x16x128xbf16> to vector<16x128xbf16>
    %288 = vector.shape_cast %284 : vector<16x128xbf16> to vector<1x16x128xbf16>
    tpu.vector_store %arg6[%285, %c0_78, %c0_79], %288 {strides = array<i32>} : memref<8x16x128xbf16, #tpu.memory_space<vmem>>, vector<1x16x128xbf16>,
    %c7_i32 = arith.constant 7 : i32
    %289 = arith.index_cast %c7_i32 : i32 to index
    %c0_80 = arith.constant 0 : index
    %c0_81 = arith.constant 0 : index
    %290 = vector.load %arg3[%289, %c0_80, %c0_81] : memref<8x16x128xf32, #tpu.memory_space<vmem>>, vector<1x16x128xf32>
    %291 = vector.shape_cast %290 : vector<1x16x128xf32> to vector<16x128xf32>
    %292 = vector.broadcast %3 : vector<1x128xf32> to vector<16x128xf32>
    %293 = arith.mulf %292, %273 : vector<16x128xf32>
    %294 = arith.addf %291, %293 : vector<16x128xf32>
    %cst_82 = arith.constant 0.000000e+00 : f32
    %295 = vector.broadcast %cst_82 : f32 to vector<16x128xf32>
    %296 = arith.maximumf %294, %295 : vector<16x128xf32>
    %297 = vector.broadcast %4 : vector<1x128xf32> to vector<16x128xf32>
    %298 = arith.mulf %296, %297 : vector<16x128xf32>
    %299 = vector.broadcast %5 : vector<1x128xf32> to vector<16x128xf32>
    %300 = arith.addf %298, %299 : vector<16x128xf32>
    %301 = arith.negf %300 : vector<16x128xf32>
    %302 = math.exp %301 : vector<16x128xf32>
    %cst_83 = arith.constant 1.000000e+00 : f32
    %303 = vector.broadcast %cst_83 : f32 to vector<16x128xf32>
    %304 = arith.addf %303, %302 : vector<16x128xf32>
    %305 = arith.divf %303, %304 : vector<16x128xf32>
    %cst_84 = arith.constant 1.000000e+00 : f32
    %306 = vector.broadcast %cst_84 : f32 to vector<16x128xf32>
    %307 = arith.subf %306, %279 : vector<16x128xf32>
    %308 = arith.minimumf %276, %307 : vector<16x128xf32>
    %309 = arith.addf %279, %308 : vector<16x128xf32>
    %310 = math.roundeven %309 : vector<16x128xf32>
    %311 = arith.subf %296, %273 : vector<16x128xf32>
    %312 = arith.mulf %310, %311 : vector<16x128xf32>
    %313 = arith.addf %273, %312 : vector<16x128xf32>
    %314 = arith.subf %305, %276 : vector<16x128xf32>
    %315 = arith.mulf %310, %314 : vector<16x128xf32>
    %316 = arith.addf %276, %315 : vector<16x128xf32>
    %cst_85 = arith.constant 1.000000e+00 : f32
    %317 = vector.broadcast %cst_85 : f32 to vector<16x128xf32>
    %318 = arith.subf %317, %310 : vector<16x128xf32>
    %319 = arith.mulf %318, %309 : vector<16x128xf32>
    %320 = arith.index_cast %c7_i32 : i32 to index
    %c0_86 = arith.constant 0 : index
    %c0_87 = arith.constant 0 : index
    %321 = vector.load %arg5[%320, %c0_86, %c0_87] : memref<8x16x128xf32, #tpu.memory_space<vmem>>, vector<1x16x128xf32>
    %322 = vector.shape_cast %321 : vector<1x16x128xf32> to vector<16x128xf32>
    %323 = vector.shape_cast %313 : vector<16x128xf32> to vector<1x16x128xf32>
    tpu.vector_store %arg5[%320, %c0_86, %c0_87], %323 {strides = array<i32>} : memref<8x16x128xf32, #tpu.memory_space<vmem>>, vector<1x16x128xf32>,
    %324 = arith.truncf %310 : vector<16x128xf32> to vector<16x128xbf16>
    %325 = arith.index_cast %c7_i32 : i32 to index
    %c0_88 = arith.constant 0 : index
    %c0_89 = arith.constant 0 : index
    %326 = vector.load %arg6[%325, %c0_88, %c0_89] : memref<8x16x128xbf16, #tpu.memory_space<vmem>>, vector<1x16x128xbf16>
    %327 = vector.shape_cast %326 : vector<1x16x128xbf16> to vector<16x128xbf16>
    %328 = vector.shape_cast %324 : vector<16x128xbf16> to vector<1x16x128xbf16>
    tpu.vector_store %arg6[%325, %c0_88, %c0_89], %328 {strides = array<i32>} : memref<8x16x128xbf16, #tpu.memory_space<vmem>>, vector<1x16x128xbf16>,
    %c8_i32 = arith.constant 8 : i32
    %c0_90 = arith.constant 0 : index
    %c0_91 = arith.constant 0 : index
    %329 = vector.load %arg7[%c0_90, %c0_91] : memref<16x128xf32, #tpu.memory_space<vmem>>, vector<16x128xf32>
    tpu.vector_store %arg7[%c0_90, %c0_91], %313 {strides = array<i32>} : memref<16x128xf32, #tpu.memory_space<vmem>>, vector<16x128xf32>,
    %c0_92 = arith.constant 0 : index
    %c0_93 = arith.constant 0 : index
    %330 = vector.load %arg8[%c0_92, %c0_93] : memref<16x128xf32, #tpu.memory_space<vmem>>, vector<16x128xf32>
    tpu.vector_store %arg8[%c0_92, %c0_93], %316 {strides = array<i32>} : memref<16x128xf32, #tpu.memory_space<vmem>>, vector<16x128xf32>,
    %c0_94 = arith.constant 0 : index
    %c0_95 = arith.constant 0 : index
    %331 = vector.load %arg9[%c0_94, %c0_95] : memref<16x128xf32, #tpu.memory_space<vmem>>, vector<16x128xf32>
    tpu.vector_store %arg9[%c0_94, %c0_95], %319 {strides = array<i32>} : memref<16x128xf32, #tpu.memory_space<vmem>>, vector<16x128xf32>,
    return
  }
  func.func @transform_0(%arg0: i32, %arg1: i32, %arg2: i32) -> (i32, i32, i32) {
    %c0_i32 = arith.constant 0 : i32
    return %arg2, %arg1, %arg0 : i32, i32, i32
  }
  func.func @transform_1(%arg0: i32, %arg1: i32, %arg2: i32) -> (i32, i32) {
    %c0_i32 = arith.constant 0 : i32
    %c0_i32_0 = arith.constant 0 : i32
    return %c0_i32, %arg0 : i32, i32
  }
  func.func @transform_2(%arg0: i32, %arg1: i32, %arg2: i32) -> (i32, i32, i32) {
    %c0_i32 = arith.constant 0 : i32
    return %arg2, %arg1, %arg0 : i32, i32, i32
  }
  func.func @transform_3(%arg0: i32, %arg1: i32, %arg2: i32) -> (i32, i32, i32) {
    %c0_i32 = arith.constant 0 : i32
    return %arg2, %arg1, %arg0 : i32, i32, i32
  }
}

</mosaic_0001>

<bundles_post_ra>
// kernel: tpu_custom_call.1
= control target key start
LH: loop header
LB: loop body
LE: loop exit
PB: predicated region body
PF: predicated region fallthrough
CT: control target
= control target key end

     0   :  { %9 = vsyncpa [#allocation6], 0  ;;  %s1068_s0 = inlined_call_operand.hbm [shape: f32[8,16,128], index: 0, kind: input, shape index: {}]   ;;  %s1069_s1 = inlined_call_operand.hbm [shape: f32[4,128], index: 1, kind: input, shape index: {}]   ;;  %s1070_s2 = inlined_call_operand.hbm [shape: f32[8,16,128], index: 2, kind: output, shape index: {0}]   ;;  %s1071_s3 = inlined_call_operand.hbm [shape: bf16[8,16,128], index: 3, kind: output, shape index: {1}]  }
   0x1   :  { %10 = vsyncpa [#allocation9], 0 }
   0x2   :  { %11 = vsyncpa [#allocation7], 0 }
   0x3   :  { %12 = vsyncpa [#allocation12], 0  ;;  %s888_s12 = smov [#allocation5]   ;;  %s792_s16 = scalar_lea.hbm %s1068_s0, 2048 }
   0x4   :  { %s18_s13 = sshll.u32 %s888_s12, 4  ;;  %p793_p0 = scmp.ne.s32.totalorder %s1068_s0, %s792_s16  ;;  %s19_s13 = int_to_ptr.vmem [resolvable:$true] %s18_s13 }
   0x5   :  { %p796_p1 = scmp.lt.u32.totalorder %s792_s16, %s1068_s0 }
   0x7   :  { %p798_p2 = pnand %p796_p1, %p793_p0 }
   0x9   :  { %801 = shalt.err (!%p798_p2)
}
   0xa   :  { %s802_s21 = scalar_lea.vmem %s19_s13, 2048  ;;  %p807_p4 = scmp.lt.s32.totalorder %s19_s13, %s19_s13 }
   0xb   :  { %p803_p3 = scmp.ne.s32.totalorder %s19_s13, %s802_s21  ;;  %p808_p5 = scmp.lt.s32.totalorder %s802_s21, %s802_s21 }
   0xd   :  { %p809_p6 = por %p808_p5, %p807_p4 }
   0xf   :  { %p810_p7 = pnand %p809_p6, %p803_p3 }
  0x11   :  { %813 = shalt.err (!%p810_p7)
}
  0x12   :  { %s889_s22 = smov 128   ;;  %s890_s23 = smov 8  }
  0x13   :  { %24 = dma.hbm_to_vmem [thread:$0]  %s1068_s0, 2048, %s19_s13, [#allocation6], %s889_s22, %s889_s22, %s890_s23  }
  0x14   :  { %s891_s26 = smov [#allocation8]   ;;  %s814_s30 = scalar_lea.hbm %s1069_s1, 64 }
  0x15   :  { %s31_s27 = sshll.u32 %s891_s26, 4  ;;  %p815_p8 = scmp.ne.s32.totalorder %s1069_s1, %s814_s30  ;;  %s32_s27 = int_to_ptr.vmem [resolvable:$true] %s31_s27 }
  0x16   :  { %p818_p9 = scmp.lt.u32.totalorder %s814_s30, %s1069_s1 }
  0x18   :  { %p820_p10 = pnand %p818_p9, %p815_p8 }
  0x1a   :  { %823 = shalt.err (!%p820_p10)
}
  0x1b   :  { %s824_s8 = scalar_lea.vmem %s32_s27, 64  ;;  %p829_p12 = scmp.lt.s32.totalorder %s32_s27, %s32_s27 }
  0x1c   :  { %p825_p11 = scmp.ne.s32.totalorder %s32_s27, %s824_s8  ;;  %p830_p13 = scmp.lt.s32.totalorder %s824_s8, %s824_s8 }
  0x1e   :  { %p831_p0 = por %p830_p13, %p829_p12 }
  0x20   :  { %p832_p1 = pnand %p831_p0, %p825_p11 }
  0x22   :  { %835 = shalt.err (!%p832_p1)
}
  0x23   :  { %34 = dma.hbm_to_vmem [thread:$0]  %s1069_s1, 64, %s32_s27, [#allocation9]  }
  0x24   :  { %880 = dma.done.wait [#allocation6], 2048  }
  0x25   :  { %881 = vsyncadd [#allocation6], 4294965248 }
  0x26   :  { %882 = dma.done.wait [#allocation9], 64  }
  0x27   :  { %883 = vsyncadd [#allocation9], 4294967232  ;;  %v892_v0 = vmov 1.0   ;;  %v618_v3 = vld [vmem:[#allocation8 + $0x3] ss:$0 sm:$0xff]  ;;  %v66_v7 = vld [vmem:[#allocation5 + $0x8] sm:$0xff] }
  0x28   :  { %v944_v1 = vround.rtne.f32 %v892_v0  ;;  %v948_v4 = vld [vmem:[#allocation8] ss:$0 sm:$0xff]  ;;  %v951_v10 = vld [vmem:[#allocation8 + $0x1] ss:$0 sm:$0xff]  ;;  %v953_v13 = vld [vmem:[#allocation8 + $0x2] ss:$0 sm:$0xff] }
  0x29   :  { %v65_v5 = vld [vmem:[#allocation5] sm:$0xff]  ;;  %v71_v6 = vmul.f32 %v948_v4, %v618_v3  ;;  %v138_v26 = vld [vmem:[#allocation5 + $0x10] sm:$0xff]  ;;  %v139_v27 = vld [vmem:[#allocation5 + $0x18] sm:$0xff]  ;;  %s893_s1 = smov [#allocation11]   ;;  %s894_s11 = smov [#allocation10]  }
  0x2a   :  { %v673_v2 = vpack.c.bf16 %v944_v1, %v944_v1  ;;  %v121_v45 = vsub.f32 1.0, %v944_v1  ;;  %s601_s10 = sshll.u32 %s893_s1, 4  ;;  %s589_s12 = sshll.u32 %s894_s11, 4  ;;  %s602_s10 = int_to_ptr.vmem [resolvable:$true] %s601_s10  ;;  %s1034_s12 = int_to_ptr.vmem [resolvable:$true] %s589_s12 }
  0x2b   :  { %v73_v8 = vadd.f32 %v71_v6, %v65_v5  ;;  %v74_v9 = vadd.f32 %v71_v6, %v66_v7  ;;  %s836_s13 = scalar_lea.vmem %s602_s10, 1024  ;;  %p841_p3 = scmp.lt.s32.totalorder %s602_s10, %s602_s10 }
  0x2c   :  { %674 = vst [vmem:[#allocation11] sm:$0xff] %v673_v2   ;;  %v162_v53 = vsub.f32 1.0, %v121_v45  ;;  %p837_p2 = scmp.ne.s32.totalorder %s602_s10, %s836_s13  ;;  %p842_p4 = scmp.lt.s32.totalorder %s836_s13, %s836_s13 }
  0x2d   :  { %v75_v11 = vmax.f32 %v73_v8, 0.0  ;;  %v76_v12 = vmax.f32 %v74_v9, 0.0 }
  0x2e   :  { %p843_p5 = por %p842_p4, %p841_p3 }
  0x2f   :  { %v81_v14 = vmul.f32 %v951_v10, %v75_v11  ;;  %v109_v15 = vsub.f32 %v75_v11, %v618_v3  ;;  %v82_v16 = vmul.f32 %v951_v10, %v76_v12  ;;  %v110_v17 = vsub.f32 %v76_v12, %v618_v3 }
  0x30   :  { %p844_p6 = pnand %p843_p5, %p837_p2 }
  0x31   :  { %v87_v18 = vadd.f32 %v953_v13, %v81_v14  ;;  %v111_v19 = vmul.f32 %v944_v1, %v109_v15  ;;  %v88_v20 = vadd.f32 %v953_v13, %v82_v16  ;;  %v112_v21 = vmul.f32 %v944_v1, %v110_v17 }
  0x33   :  { %v622_v22 = vmul.f32 -1.442695, %v87_v18  ;;  %v113_v23 = vadd.f32 %v618_v3, %v111_v19  ;;  %v623_v24 = vmul.f32 -1.442695, %v88_v20  ;;  %v114_v25 = vadd.f32 %v618_v3, %v112_v21  ;;  %v201_v18 = vld [vmem:[#allocation5 + $0x20] sm:$0xff] }
  0x35   :  { %736 = vpow2.f32 %v622_v22  ;;  %125 = vst [vmem:[#allocation10] sm:$0xff] %v113_v23  ;;  %v140_v28 = vmul.f32 %v948_v4, %v113_v23  ;;  %126 = vst [vmem:[#allocation10 + $0x8] sm:$0xff] %v114_v25  ;;  %v141_v29 = vmul.f32 %v948_v4, %v114_v25 }
  0x36   :  { %738 = vpow2.f32 %v623_v24  ;;  %v202_v24 = vld [vmem:[#allocation5 + $0x28] sm:$0xff] }
  0x37   :  { %v142_v30 = vadd.f32 %v140_v28, %v138_v26  ;;  %v143_v31 = vadd.f32 %v141_v29, %v139_v27 }
  0x39   :  { %v144_v32 = vmax.f32 %v142_v30, 0.0  ;;  %v145_v33 = vmax.f32 %v143_v31, 0.0 }
  0x3b   :  { %v146_v34 = vmul.f32 %v951_v10, %v144_v32  ;;  %v147_v35 = vmul.f32 %v951_v10, %v145_v33  ;;  %v170_v61 = vsub.f32 %v144_v32, %v113_v23  ;;  %v171_v63 = vsub.f32 %v145_v33, %v114_v25 }
  0x3d   :  { %v148_v36 = vadd.f32 %v953_v13, %v146_v34  ;;  %v149_v37 = vadd.f32 %v953_v13, %v147_v35 }
  0x3f   :  { %v737_v38 = vpop.eup %736  ;;  %v626_v39 = vmul.f32 -1.442695, %v148_v36  ;;  %v627_v42 = vmul.f32 -1.442695, %v149_v37 }
  0x40   :  { %v739_v40 = vpop.eup %738  ;;  %v95_v41 = vadd.f32 1.0, %v737_v38 }
  0x41   :  { %v96_v43 = vadd.f32 1.0, %v739_v40  ;;  %740 = vpow2.f32 %v626_v39 }
  0x42   :  { %742 = vrcp.f32 %v95_v41 }
  0x43   :  { %744 = vrcp.f32 %v96_v43 }
  0x44   :  { %746 = vpow2.f32 %v627_v42 }
  0x4b   :  { %v741_v44 = vpop.eup %740 }
  0x4c   :  { %v743_v46 = vpop.eup %742  ;;  %v156_v47 = vadd.f32 1.0, %v741_v44 }
  0x4d   :  { %v745_v48 = vpop.eup %744  ;;  %v710_v49 = vadd.f32 -1.0, %v743_v46 }
  0x4e   :  { %v747_v50 = vpop.eup %746  ;;  %v711_v51 = vadd.f32 -1.0, %v745_v48  ;;  %748 = vrcp.f32 %v156_v47 }
  0x4f   :  { %v117_v52 = vmul.f32 %v944_v1, %v710_v49  ;;  %v157_v54 = vadd.f32 1.0, %v747_v50  ;;  %v264_v50 = vld [vmem:[#allocation5 + $0x30] sm:$0xff] }
  0x50   :  { %v118_v55 = vmul.f32 %v944_v1, %v711_v51 }
  0x51   :  { %v119_v56 = vadd.f32 1.0, %v117_v52  ;;  %750 = vrcp.f32 %v157_v54  ;;  %v265_v54 = vld [vmem:[#allocation5 + $0x38] sm:$0xff] }
  0x52   :  { %v120_v57 = vadd.f32 1.0, %v118_v55 }
  0x53   :  { %v164_v58 = vmin.f32 %v119_v56, %v162_v53 }
  0x54   :  { %v165_v59 = vmin.f32 %v120_v57, %v162_v53 }
  0x55   :  { %v166_v60 = vadd.f32 %v164_v58, %v121_v45 }
  0x56   :  { %v167_v62 = vadd.f32 %v165_v59, %v121_v45 }
  0x57   :  { %v713_v0 = vround.rtne.f32 %v166_v60 }
  0x58   :  { %v749_v2 = vpop.eup %748  ;;  %v714_v3 = vround.rtne.f32 %v167_v62 }
  0x59   :  { %v172_v5 = vmul.f32 %v713_v0, %v170_v61  ;;  %v176_v6 = vsub.f32 %v749_v2, %v119_v56  ;;  %v182_v7 = vsub.f32 1.0, %v713_v0 }
  0x5a   :  { %v173_v8 = vmul.f32 %v714_v3, %v171_v63  ;;  %v678_v9 = vpack.c.bf16 %v714_v3, %v713_v0  ;;  %v183_v11 = vsub.f32 1.0, %v714_v3 }
  0x5b   :  { %v751_v12 = vpop.eup %750  ;;  %v174_v1 = vadd.f32 %v172_v5, %v113_v23  ;;  %v178_v14 = vmul.f32 %v713_v0, %v176_v6  ;;  %v184_v15 = vmul.f32 %v182_v7, %v166_v60 }
  0x5c   :  { %v175_v16 = vadd.f32 %v173_v8, %v114_v25  ;;  %v177_v17 = vsub.f32 %v751_v12, %v120_v57  ;;  %679 = vst [vmem:[#allocation11 + $0x8] sm:$0xff] %v678_v9   ;;  %v185_v19 = vmul.f32 %v183_v11, %v167_v62 }
  0x5d   :  { %187 = vst [vmem:[#allocation10 + $0x10] sm:$0xff] %v174_v1  ;;  %v203_v20 = vmul.f32 %v948_v4, %v174_v1  ;;  %v971_v21 = vadd.f32 %v178_v14, %v119_v56  ;;  %v225_v22 = vsub.f32 1.0, %v184_v15 }
  0x5e   :  { %v179_v26 = vmul.f32 %v714_v3, %v177_v17  ;;  %188 = vst [vmem:[#allocation10 + $0x18] sm:$0xff] %v175_v16  ;;  %v204_v27 = vmul.f32 %v948_v4, %v175_v16  ;;  %v226_v28 = vsub.f32 1.0, %v185_v19 }
  0x5f   :  { %v205_v23 = vadd.f32 %v203_v20, %v201_v18  ;;  %v227_v29 = vmin.f32 %v971_v21, %v225_v22 }
  0x60   :  { %v975_v25 = vadd.f32 %v179_v26, %v120_v57  ;;  %v206_v30 = vadd.f32 %v204_v27, %v202_v24 }
  0x61   :  { %v207_v31 = vmax.f32 %v205_v23, 0.0  ;;  %v229_v32 = vadd.f32 %v227_v29, %v184_v15 }
  0x62   :  { %v208_v33 = vmax.f32 %v206_v30, 0.0  ;;  %v228_v34 = vmin.f32 %v975_v25, %v226_v28 }
  0x63   :  { %v209_v35 = vmul.f32 %v951_v10, %v207_v31  ;;  %v715_v36 = vround.rtne.f32 %v229_v32  ;;  %v233_v37 = vsub.f32 %v207_v31, %v174_v1 }
  0x64   :  { %v210_v38 = vmul.f32 %v951_v10, %v208_v33  ;;  %v230_v39 = vadd.f32 %v228_v34, %v185_v19  ;;  %v234_v40 = vsub.f32 %v208_v33, %v175_v16 }
  0x65   :  { %v211_v41 = vadd.f32 %v953_v13, %v209_v35  ;;  %v235_v42 = vmul.f32 %v715_v36, %v233_v37  ;;  %v245_v7 = vsub.f32 1.0, %v715_v36 }
  0x66   :  { %v212_v43 = vadd.f32 %v953_v13, %v210_v38  ;;  %v716_v44 = vround.rtne.f32 %v230_v39 }
  0x67   :  { %v630_v45 = vmul.f32 -1.442695, %v211_v41  ;;  %v982_v46 = vadd.f32 %v235_v42, %v174_v1  ;;  %v247_v11 = vmul.f32 %v245_v7, %v229_v32 }
  0x68   :  { %v631_v47 = vmul.f32 -1.442695, %v212_v43  ;;  %v236_v48 = vmul.f32 %v716_v44, %v234_v40  ;;  %v683_v49 = vpack.c.bf16 %v716_v44, %v715_v36  ;;  %v246_v8 = vsub.f32 1.0, %v716_v44 }
  0x69   :  { %752 = vpow2.f32 %v630_v45  ;;  %250 = vst [vmem:[#allocation10 + $0x20] sm:$0xff] %v982_v46  ;;  %v266_v51 = vmul.f32 %v948_v4, %v982_v46  ;;  %v288_v20 = vsub.f32 1.0, %v247_v11 }
  0x6a   :  { %754 = vpow2.f32 %v631_v47  ;;  %v238_v52 = vadd.f32 %v236_v48, %v175_v16  ;;  %684 = vst [vmem:[#allocation11 + $0x10] sm:$0xff] %v683_v49   ;;  %v248_v14 = vmul.f32 %v246_v8, %v230_v39  ;;  %v327_v48 = vld [vmem:[#allocation5 + $0x40] sm:$0xff] }
  0x6b   :  { %v268_v53 = vadd.f32 %v266_v51, %v264_v50 }
  0x6c   :  { %251 = vst [vmem:[#allocation10 + $0x28] sm:$0xff] %v238_v52  ;;  %v267_v55 = vmul.f32 %v948_v4, %v238_v52  ;;  %v289_v26 = vsub.f32 1.0, %v248_v14 }
  0x6d   :  { %v270_v56 = vmax.f32 %v268_v53, 0.0 }
  0x6e   :  { %v269_v57 = vadd.f32 %v267_v55, %v265_v54  ;;  %v328_v54 = vld [vmem:[#allocation5 + $0x48] sm:$0xff] }
  0x6f   :  { %v272_v58 = vmul.f32 %v951_v10, %v270_v56  ;;  %v296_v31 = vsub.f32 %v270_v56, %v982_v46 }
  0x70   :  { %v271_v59 = vmax.f32 %v269_v57, 0.0 }
  0x71   :  { %v274_v60 = vadd.f32 %v953_v13, %v272_v58 }
  0x72   :  { %v273_v61 = vmul.f32 %v951_v10, %v271_v59  ;;  %v297_v33 = vsub.f32 %v271_v59, %v238_v52 }
  0x73   :  { %v753_v62 = vpop.eup %752  ;;  %v634_v63 = vmul.f32 -1.442695, %v274_v60 }
  0x74   :  { %v755_v0 = vpop.eup %754  ;;  %v219_v2 = vadd.f32 1.0, %v753_v62  ;;  %v275_v3 = vadd.f32 %v953_v13, %v273_v61 }
  0x75   :  { %v220_v5 = vadd.f32 1.0, %v755_v0  ;;  %756 = vpow2.f32 %v634_v63 }
  0x76   :  { %758 = vrcp.f32 %v219_v2  ;;  %v635_v6 = vmul.f32 -1.442695, %v275_v3 }
  0x77   :  { %760 = vrcp.f32 %v220_v5 }
  0x78   :  { %762 = vpow2.f32 %v635_v6 }
  0x7f   :  { %v757_v9 = vpop.eup %756 }
  0x80   :  { %v759_v12 = vpop.eup %758  ;;  %v282_v1 = vadd.f32 1.0, %v757_v9 }
  0x81   :  { %v761_v15 = vpop.eup %760  ;;  %v239_v16 = vsub.f32 %v759_v12, %v971_v21 }
  0x82   :  { %v763_v17 = vpop.eup %762  ;;  %v240_v18 = vsub.f32 %v761_v15, %v975_v25  ;;  %764 = vrcp.f32 %v282_v1 }
  0x83   :  { %v241_v19 = vmul.f32 %v715_v36, %v239_v16  ;;  %v283_v22 = vadd.f32 1.0, %v763_v17 }
  0x84   :  { %v242_v24 = vmul.f32 %v716_v44, %v240_v18  ;;  %v390_v18 = vld [vmem:[#allocation5 + $0x50] sm:$0xff] }
  0x85   :  { %v243_v27 = vadd.f32 %v241_v19, %v971_v21  ;;  %766 = vrcp.f32 %v283_v22 }
  0x86   :  { %v244_v28 = vadd.f32 %v242_v24, %v975_v25  ;;  %v391_v24 = vld [vmem:[#allocation5 + $0x58] sm:$0xff] }
  0x87   :  { %v290_v23 = vmin.f32 %v243_v27, %v288_v20 }
  0x88   :  { %v291_v29 = vmin.f32 %v244_v28, %v289_v26 }
  0x89   :  { %v292_v30 = vadd.f32 %v290_v23, %v247_v11 }
  0x8a   :  { %v293_v32 = vadd.f32 %v291_v29, %v248_v14 }
  0x8b   :  { %v717_v34 = vround.rtne.f32 %v292_v30 }
  0x8c   :  { %v765_v35 = vpop.eup %764  ;;  %v718_v37 = vround.rtne.f32 %v293_v32 }
  0x8d   :  { %v298_v36 = vmul.f32 %v717_v34, %v296_v31  ;;  %v302_v38 = vsub.f32 %v765_v35, %v243_v27  ;;  %v308_v39 = vsub.f32 1.0, %v717_v34 }
  0x8e   :  { %v299_v40 = vmul.f32 %v718_v37, %v297_v33  ;;  %v688_v41 = vpack.c.bf16 %v718_v37, %v717_v34  ;;  %v309_v42 = vsub.f32 1.0, %v718_v37 }
  0x8f   :  { %v767_v21 = vpop.eup %766  ;;  %v300_v43 = vadd.f32 %v298_v36, %v982_v46  ;;  %v304_v25 = vmul.f32 %v717_v34, %v302_v38  ;;  %v310_v44 = vmul.f32 %v308_v39, %v292_v30 }
  0x90   :  { %v301_v45 = vadd.f32 %v299_v40, %v238_v52  ;;  %v303_v47 = vsub.f32 %v767_v21, %v244_v28  ;;  %689 = vst [vmem:[#allocation11 + $0x18] sm:$0xff] %v688_v41   ;;  %v311_v49 = vmul.f32 %v309_v42, %v293_v32 }
  0x91   :  { %313 = vst [vmem:[#allocation10 + $0x30] sm:$0xff] %v300_v43  ;;  %v329_v50 = vmul.f32 %v948_v4, %v300_v43  ;;  %v999_v51 = vadd.f32 %v304_v25, %v243_v27  ;;  %v351_v53 = vsub.f32 1.0, %v310_v44 }
  0x92   :  { %v305_v55 = vmul.f32 %v718_v37, %v303_v47  ;;  %314 = vst [vmem:[#allocation10 + $0x38] sm:$0xff] %v301_v45  ;;  %v330_v56 = vmul.f32 %v948_v4, %v301_v45  ;;  %v352_v57 = vsub.f32 1.0, %v311_v49 }
  0x93   :  { %v331_v46 = vadd.f32 %v329_v50, %v327_v48  ;;  %v353_v58 = vmin.f32 %v999_v51, %v351_v53 }
  0x94   :  { %v1003_v52 = vadd.f32 %v305_v55, %v244_v28  ;;  %v332_v59 = vadd.f32 %v330_v56, %v328_v54 }
  0x95   :  { %v333_v60 = vmax.f32 %v331_v46, 0.0  ;;  %v355_v61 = vadd.f32 %v353_v58, %v310_v44 }
  0x96   :  { %v334_v62 = vmax.f32 %v332_v59, 0.0  ;;  %v354_v63 = vmin.f32 %v1003_v52, %v352_v57 }
  0x97   :  { %v335_v0 = vmul.f32 %v951_v10, %v333_v60  ;;  %v719_v2 = vround.rtne.f32 %v355_v61  ;;  %v359_v3 = vsub.f32 %v333_v60, %v300_v43 }
  0x98   :  { %v336_v5 = vmul.f32 %v951_v10, %v334_v62  ;;  %v356_v6 = vadd.f32 %v354_v63, %v311_v49  ;;  %v360_v7 = vsub.f32 %v334_v62, %v301_v45 }
  0x99   :  { %v337_v8 = vadd.f32 %v953_v13, %v335_v0  ;;  %v361_v9 = vmul.f32 %v719_v2, %v359_v3  ;;  %v371_v39 = vsub.f32 1.0, %v719_v2 }
  0x9a   :  { %v338_v11 = vadd.f32 %v953_v13, %v336_v5  ;;  %v720_v12 = vround.rtne.f32 %v356_v6 }
  0x9b   :  { %v638_v1 = vmul.f32 -1.442695, %v337_v8  ;;  %v1010_v14 = vadd.f32 %v361_v9, %v300_v43  ;;  %v373_v42 = vmul.f32 %v371_v39, %v355_v61 }
  0x9c   :  { %v639_v15 = vmul.f32 -1.442695, %v338_v11  ;;  %v362_v16 = vmul.f32 %v720_v12, %v360_v7  ;;  %v693_v17 = vpack.c.bf16 %v720_v12, %v719_v2  ;;  %v372_v40 = vsub.f32 1.0, %v720_v12 }
  0x9d   :  { %768 = vpow2.f32 %v638_v1  ;;  %376 = vst [vmem:[#allocation10 + $0x40] sm:$0xff] %v1010_v14  ;;  %v392_v19 = vmul.f32 %v948_v4, %v1010_v14  ;;  %v414_v50 = vsub.f32 1.0, %v373_v42 }
  0x9e   :  { %770 = vpow2.f32 %v639_v15  ;;  %v364_v20 = vadd.f32 %v362_v16, %v301_v45  ;;  %694 = vst [vmem:[#allocation11 + $0x20] sm:$0xff] %v693_v17   ;;  %v374_v25 = vmul.f32 %v372_v40, %v356_v6  ;;  %v453_v16 = vld [vmem:[#allocation5 + $0x60] sm:$0xff] }
  0x9f   :  { %v394_v22 = vadd.f32 %v392_v19, %v390_v18 }
  0xa0   :  { %377 = vst [vmem:[#allocation10 + $0x48] sm:$0xff] %v364_v20  ;;  %v393_v26 = vmul.f32 %v948_v4, %v364_v20  ;;  %v415_v55 = vsub.f32 1.0, %v374_v25 }
  0xa1   :  { %v396_v27 = vmax.f32 %v394_v22, 0.0 }
  0xa2   :  { %v395_v28 = vadd.f32 %v393_v26, %v391_v24  ;;  %v454_v24 = vld [vmem:[#allocation5 + $0x68] sm:$0xff] }
  0xa3   :  { %v398_v23 = vmul.f32 %v951_v10, %v396_v27  ;;  %v422_v60 = vsub.f32 %v396_v27, %v1010_v14 }
  0xa4   :  { %v397_v29 = vmax.f32 %v395_v28, 0.0 }
  0xa5   :  { %v400_v30 = vadd.f32 %v953_v13, %v398_v23 }
  0xa6   :  { %v399_v31 = vmul.f32 %v951_v10, %v397_v29  ;;  %v423_v62 = vsub.f32 %v397_v29, %v364_v20 }
  0xa7   :  { %v769_v32 = vpop.eup %768  ;;  %v642_v33 = vmul.f32 -1.442695, %v400_v30 }
  0xa8   :  { %v771_v34 = vpop.eup %770  ;;  %v345_v35 = vadd.f32 1.0, %v769_v32  ;;  %v401_v37 = vadd.f32 %v953_v13, %v399_v31 }
  0xa9   :  { %v346_v36 = vadd.f32 1.0, %v771_v34  ;;  %772 = vpow2.f32 %v642_v33 }
  0xaa   :  { %774 = vrcp.f32 %v345_v35  ;;  %v643_v38 = vmul.f32 -1.442695, %v401_v37 }
  0xab   :  { %776 = vrcp.f32 %v346_v36 }
  0xac   :  { %778 = vpow2.f32 %v643_v38 }
  0xb3   :  { %v773_v41 = vpop.eup %772 }
  0xb4   :  { %v775_v21 = vpop.eup %774  ;;  %v408_v43 = vadd.f32 1.0, %v773_v41 }
  0xb5   :  { %v777_v44 = vpop.eup %776  ;;  %v365_v45 = vsub.f32 %v775_v21, %v999_v51 }
  0xb6   :  { %v779_v47 = vpop.eup %778  ;;  %v366_v48 = vsub.f32 %v777_v44, %v1003_v52  ;;  %780 = vrcp.f32 %v408_v43 }
  0xb7   :  { %v367_v49 = vmul.f32 %v719_v2, %v365_v45  ;;  %v409_v53 = vadd.f32 1.0, %v779_v47 }
  0xb8   :  { %v368_v54 = vmul.f32 %v720_v12, %v366_v48 }
  0xb9   :  { %v369_v56 = vadd.f32 %v367_v49, %v999_v51  ;;  %782 = vrcp.f32 %v409_v53 }
  0xba   :  { %v370_v57 = vadd.f32 %v368_v54, %v1003_v52 }
  0xbb   :  { %v416_v46 = vmin.f32 %v369_v56, %v414_v50 }
  0xbc   :  { %v417_v58 = vmin.f32 %v370_v57, %v415_v55 }
  0xbd   :  { %v418_v59 = vadd.f32 %v416_v46, %v373_v42 }
  0xbe   :  { %v419_v61 = vadd.f32 %v417_v58, %v374_v25  ;;  %v517_v58 = vld [vmem:[#allocation5 + $0x78] sm:$0xff] }
  0xbf   :  { %v721_v63 = vround.rtne.f32 %v418_v59 }
  0xc0   :  { %v781_v0 = vpop.eup %780  ;;  %v722_v3 = vround.rtne.f32 %v419_v61 }
  0xc1   :  { %v424_v2 = vmul.f32 %v721_v63, %v422_v60  ;;  %v428_v5 = vsub.f32 %v781_v0, %v369_v56  ;;  %v434_v6 = vsub.f32 1.0, %v721_v63 }
  0xc2   :  { %v425_v7 = vmul.f32 %v722_v3, %v423_v62  ;;  %v698_v8 = vpack.c.bf16 %v722_v3, %v721_v63  ;;  %v435_v9 = vsub.f32 1.0, %v722_v3 }
  0xc3   :  { %v783_v51 = vpop.eup %782  ;;  %v426_v11 = vadd.f32 %v424_v2, %v1010_v14  ;;  %v430_v52 = vmul.f32 %v721_v63, %v428_v5  ;;  %v436_v12 = vmul.f32 %v434_v6, %v418_v59 }
  0xc4   :  { %v427_v1 = vadd.f32 %v425_v7, %v364_v20  ;;  %v429_v15 = vsub.f32 %v783_v51, %v370_v57  ;;  %699 = vst [vmem:[#allocation11 + $0x28] sm:$0xff] %v698_v8   ;;  %v437_v17 = vmul.f32 %v435_v9, %v419_v61 }
  0xc5   :  { %439 = vst [vmem:[#allocation10 + $0x50] sm:$0xff] %v426_v11  ;;  %v455_v18 = vmul.f32 %v948_v4, %v426_v11  ;;  %v432_v19 = vadd.f32 %v430_v52, %v369_v56  ;;  %v477_v22 = vsub.f32 1.0, %v436_v12  ;;  %v516_v56 = vld [vmem:[#allocation5 + $0x70] sm:$0xff] }
  0xc6   :  { %v431_v26 = vmul.f32 %v722_v3, %v429_v15  ;;  %440 = vst [vmem:[#allocation10 + $0x58] sm:$0xff] %v427_v1  ;;  %v456_v27 = vmul.f32 %v948_v4, %v427_v1  ;;  %v478_v28 = vsub.f32 1.0, %v437_v17 }
  0xc7   :  { %v457_v23 = vadd.f32 %v455_v18, %v453_v16  ;;  %v479_v14 = vmin.f32 %v432_v19, %v477_v22 }
  0xc8   :  { %v433_v29 = vadd.f32 %v431_v26, %v370_v57  ;;  %v458_v30 = vadd.f32 %v456_v27, %v454_v24 }
  0xc9   :  { %v459_v20 = vmax.f32 %v457_v23, 0.0  ;;  %v481_v31 = vadd.f32 %v479_v14, %v436_v12 }
  0xca   :  { %v460_v32 = vmax.f32 %v458_v30, 0.0  ;;  %v480_v33 = vmin.f32 %v433_v29, %v478_v28 }
  0xcb   :  { %v461_v34 = vmul.f32 %v951_v10, %v459_v20  ;;  %v723_v35 = vround.rtne.f32 %v481_v31  ;;  %v485_v37 = vsub.f32 %v459_v20, %v426_v11 }
  0xcc   :  { %v462_v36 = vmul.f32 %v951_v10, %v460_v32  ;;  %v482_v38 = vadd.f32 %v480_v33, %v437_v17  ;;  %v486_v39 = vsub.f32 %v460_v32, %v427_v1 }
  0xcd   :  { %v463_v40 = vadd.f32 %v953_v13, %v461_v34  ;;  %v487_v41 = vmul.f32 %v723_v35, %v485_v37  ;;  %v497_v54 = vsub.f32 1.0, %v723_v35 }
  0xce   :  { %v464_v42 = vadd.f32 %v953_v13, %v462_v36  ;;  %v724_v21 = vround.rtne.f32 %v482_v38 }
  0xcf   :  { %v646_v43 = vmul.f32 -1.442695, %v463_v40  ;;  %v489_v25 = vadd.f32 %v487_v41, %v426_v11  ;;  %v499_v46 = vmul.f32 %v497_v54, %v481_v31 }
  0xd0   :  { %v647_v44 = vmul.f32 -1.442695, %v464_v42  ;;  %v488_v45 = vmul.f32 %v724_v21, %v486_v39  ;;  %v703_v47 = vpack.c.bf16 %v724_v21, %v723_v35  ;;  %v498_v13 = vsub.f32 1.0, %v724_v21 }
  0xd1   :  { %784 = vpow2.f32 %v646_v43  ;;  %502 = vst [vmem:[#allocation10 + $0x60] sm:$0xff] %v489_v25  ;;  %v518_v55 = vmul.f32 %v948_v4, %v489_v25  ;;  %v540_v5 = vsub.f32 1.0, %v499_v46 }
  0xd2   :  { %786 = vpow2.f32 %v647_v44  ;;  %v490_v48 = vadd.f32 %v488_v45, %v427_v1  ;;  %704 = vst [vmem:[#allocation11 + $0x30] sm:$0xff] %v703_v47   ;;  %v500_v60 = vmul.f32 %v498_v13, %v482_v38 }
  0xd3   :  { %v520_v63 = vadd.f32 %v518_v55, %v516_v56 }
  0xd4   :  { %503 = vst [vmem:[#allocation10 + $0x68] sm:$0xff] %v490_v48  ;;  %v519_v57 = vmul.f32 %v948_v4, %v490_v48  ;;  %v541_v7 = vsub.f32 1.0, %v500_v60 }
  0xd5   :  { %v522_v9 = vmax.f32 %v520_v63, 0.0 }
  0xd6   :  { %v521_v3 = vadd.f32 %v519_v57, %v517_v58 }
  0xd7   :  { %v548_v1 = vsub.f32 %v522_v9, %v489_v25 }
  0xd8   :  { %v523_v11 = vmax.f32 %v521_v3, 0.0 }
  0xda   :  { %v549_v16 = vsub.f32 %v523_v11, %v490_v48 }
  0xdb   :  { %v785_v10 = vpop.eup %784 }
  0xdc   :  { %v787_v49 = vpop.eup %786  ;;  %v471_v50 = vadd.f32 1.0, %v785_v10 }
  0xdd   :  { %v472_v53 = vadd.f32 1.0, %v787_v49 }
  0xde   :  { %788 = vrcp.f32 %v471_v50 }
  0xdf   :  { %790 = vrcp.f32 %v472_v53 }
  0xe8   :  { %v789_v59 = vpop.eup %788 }
  0xe9   :  { %v791_v61 = vpop.eup %790  ;;  %v491_v62 = vsub.f32 %v789_v59, %v432_v19 }
  0xea   :  { %v492_v0 = vsub.f32 %v791_v61, %v433_v29 }
  0xeb   :  { %v493_v2 = vmul.f32 %v723_v35, %v491_v62 }
  0xec   :  { %v494_v6 = vmul.f32 %v724_v21, %v492_v0 }
  0xed   :  { %v495_v8 = vadd.f32 %v493_v2, %v432_v19 }
  0xee   :  { %v496_v51 = vadd.f32 %v494_v6, %v433_v29 }
  0xef   :  { %v542_v52 = vmin.f32 %v495_v8, %v540_v5 }
  0xf0   :  { %v543_v12 = vmin.f32 %v496_v51, %v541_v7 }
  0xf1   :  { %v544_v4 = vadd.f32 %v542_v52, %v499_v46 }
  0xf2   :  { %v545_v15 = vadd.f32 %v543_v12, %v500_v60 }
  0xf3   :  { %v725_v17 = vround.rtne.f32 %v544_v4 }
  0xf4   :  { %v726_v18 = vround.rtne.f32 %v545_v15 }
  0xf5   :  { %v550_v22 = vmul.f32 %v725_v17, %v548_v1 }
  0xf6   :  { %v551_v24 = vmul.f32 %v726_v18, %v549_v16  ;;  %v708_v26 = vpack.c.bf16 %v726_v18, %v725_v17 }
  0xf7   :  { %v552_v19 = vadd.f32 %v550_v22, %v489_v25 }
  0xf8   :  { %v553_v27 = vadd.f32 %v551_v24, %v490_v48  ;;  %709 = vst [vmem:[#allocation11 + $0x38] sm:$0xff] %v708_v26  }
  0xf9   :  { %565 = vst [vmem:[#allocation10 + $0x70] sm:$0xff] %v552_v19 }
  0xfa   :  { %847 = shalt.err (!%p844_p6)
}
  0xfb   :  { %s848_s16 = scalar_lea.hbm %s1071_s3, 1024 }
  0xfc   :  { %p849_p7 = scmp.ne.s32.totalorder %s1071_s3, %s848_s16  ;;  %p852_p8 = scmp.lt.u32.totalorder %s848_s16, %s1071_s3 }
  0xfe   :  { %p854_p9 = pnand %p852_p8, %p849_p7 }
 0x100   :  { %857 = shalt.err (!%p854_p9)
}
 0x101   :  { %s895_s21 = smov 64   ;;  %s896_s24 = smov 4   ;;  %566 = vst [vmem:[#allocation10 + $0x78] sm:$0xff] %v553_v27 }
 0x102   :  { %607 = dma.vmem_to_hbm [thread:$0]  %s602_s10, 1024, %s1071_s3, [#allocation12], %s895_s21, %s895_s21, %s896_s24  }
 0x103   :  { %s858_s27 = scalar_lea.vmem %s1034_s12, 2048  ;;  %p863_p11 = scmp.lt.s32.totalorder %s1034_s12, %s1034_s12 }
 0x104   :  { %p859_p10 = scmp.ne.s32.totalorder %s1034_s12, %s858_s27  ;;  %p864_p12 = scmp.lt.s32.totalorder %s858_s27, %s858_s27 }
 0x106   :  { %p865_p13 = por %p864_p12, %p863_p11 }
 0x108   :  { %p866_p0 = pnand %p865_p13, %p859_p10 }
 0x10a   :  { %869 = shalt.err (!%p866_p0)
}
 0x10b   :  { %s870_s30 = scalar_lea.hbm %s1070_s2, 2048 }
 0x10c   :  { %p871_p1 = scmp.ne.s32.totalorder %s1070_s2, %s870_s30  ;;  %p874_p2 = scmp.lt.u32.totalorder %s870_s30, %s1070_s2 }
 0x10e   :  { %p876_p3 = pnand %p874_p2, %p871_p1 }
 0x110   :  { %879 = shalt.err (!%p876_p3)
}
 0x111   :  { %595 = dma.vmem_to_hbm [thread:$0]  %s1034_s12, 2048, %s1070_s2, [#allocation7], %s889_s22, %s889_s22, %s890_s23  }
 0x112   :  { %884 = dma.done.wait [#allocation7], 2048  }
 0x113   :  { %885 = vsyncadd [#allocation7], 4294965248 }
 0x114   :  { %886 = dma.done.wait [#allocation12], 1024  }
 0x115   :  { %887 = vsyncadd [#allocation12], 4294966272 }
 0x116   :  { %614 = vsyncpa [#allocation6], 1 }
 0x117   :  { %615 = vsyncpa [#allocation9], 1 }
 0x118   :  { %616 = vsyncpa [#allocation7], 1 }
 0x119   :  { %617 = vsyncpa [#allocation12], 1 }

</bundles_post_ra>
